<compile_context>
chip_gen: v7x
topology: tpu7x:2x2x1
jax: 0.10.0
libtpu: 0.0.40
codegen_flags: <defaults>
</compile_context>

<pallas_src>
import functools

import jax
import jax.numpy as jnp
from jax.experimental import pallas as pl
from jax.experimental.pallas import tpu as pltpu


# ---------------------------------------------------------------------------
# Kernels
# ---------------------------------------------------------------------------

def _upsample_copy_kernel(x_ref, o_ref, *, stride):
    """Pure data-movement nearest-neighbor upsample.

    x_ref: (TM, W)        one packed input row per sublane row
    o_ref: (TM, s*W*s)    per-row layout [r, w, c] == row-major NCHW output
    """
    x = x_ref[...]
    # Column repeat along the minor (lane) axis: out[., w*s + c] = x[., w].
    xcol = jnp.repeat(x, stride, axis=-1)                       # (TM, W*s)
    # s row copies, r-major within the packed row: plain lane concatenation.
    o_ref[...] = jnp.concatenate([xcol] * stride, axis=-1)      # (TM, s*W*s)


def _upsample_matmul_kernel(x_ref, r_ref, o_ref, *, precision):
    # Fallback path only (see upsample()): small 0/1 replication matrix on the MXU.
    # precision is HIGHEST only for float32 (exact 0/1 copy); DEFAULT for bf16.
    o_ref[...] = jnp.dot(
        x_ref[...],
        r_ref[...],
        precision=precision,
        preferred_element_type=jnp.float32,
    ).astype(o_ref.dtype)


# ---------------------------------------------------------------------------
# Tiling / budget helpers
# ---------------------------------------------------------------------------

def _vmem_budget_bytes():
    """(pipeline buffer budget, vmem_limit_bytes) sized per TPU generation."""
    try:
        kind = jax.devices()[0].device_kind.lower()
    except Exception:
        kind = ""
    if any(tag in kind for tag in ("v2", "v3", "v4", "v5", "v6")):
        return 64 << 20, 96 << 20          # 128 MiB physical VMEM per core
    # v7x (64 MiB physical per TensorCore) or unknown generation: stay conservative.
    return 32 << 20, 48 << 20


def _pick_rows_per_block(rows, w_in, w_out, itemsize, vmem_budget):
    """Packed input rows handled per grid step.

    Targets ~3 MiB of useful output per step, keeps >=4 grid steps when the problem
    is big enough (v7x 2 TCs + pipelining), rounds to the dtype's sublane multiple,
    and respects the per-generation VMEM budget (lane-padded blocks + temporaries).
    No divisibility constraints: the last block may be partial (grid uses cdiv).
    """
    sub = max(8, 8 * (4 // max(itemsize, 1)))          # 8 / 16 / 32 for 4B / 2B / 1B
    if rows <= sub:
        return rows
    pad = lambda n: -(-n // 128) * 128 * itemsize      # lane-padded bytes per row
    per_row_vmem = 3 * (pad(w_in) + pad(w_out))        # ~double buffers + temporaries
    tm = min(
        max(sub, vmem_budget // per_row_vmem),             # fit the VMEM budget
        max(sub, (3 << 20) // max(w_out * itemsize, 1)),   # ~3 MiB of output per step
    )
    if rows > 4 * sub:                                  # prefer >= 4 grid steps
        tm = min(tm, -(-rows // 4))
    tm = max(sub, tm - tm % sub)
    return min(tm, rows)


# ---------------------------------------------------------------------------
# Public wrapper
# ---------------------------------------------------------------------------

def upsample(x: jax.Array, stride: int = 2) -> jax.Array:
    """Equivalent of torch `Upsample(stride).forward` on an NCHW tensor."""
    assert x.ndim == 4
    s = int(stride)
    if s == 1:
        return x

    B, C, H, W = x.shape
    dtype = x.dtype
    itemsize = jnp.dtype(dtype).itemsize
    rows = B * C * H
    w_out = W * s * s                       # packed output row, layout [r, w, c]

    budget, vmem_limit = _vmem_budget_bytes()
    TM = _pick_rows_per_block(rows, W, w_out, itemsize, budget)
    grid = (pl.cdiv(rows, TM),)

    x2 = x.reshape(rows, W)                 # free reshape (row-major, no transpose)

    common = dict(
        out_shape=jax.ShapeDtypeStruct((rows, w_out), dtype),
        grid=grid,
        out_specs=pl.BlockSpec((TM, w_out), lambda i: (i, 0)),
        compiler_params=pltpu.CompilerParams(
            dimension_semantics=("parallel",),     # independent row blocks
            vmem_limit_bytes=int(vmem_limit),
        ),
    )

    try:
        out2 = pl.pallas_call(
            functools.partial(_upsample_copy_kernel, stride=s),
            in_specs=[pl.BlockSpec((TM, W), lambda i: (i, 0))],
            cost_estimate=pl.CostEstimate(
                flops=rows * w_out,                  # nominal: one copy per output elem
                transcendentals=0,
                bytes_accessed=rows * (W + w_out) * itemsize,
            ),
            **common,
        )(x2)
        # Force completion here so any lowering/runtime problem is caught and the
        # fallback below can take over (test-script friendly; negligible cost).
        out2 = jax.block_until_ready(out2)
    except Exception:
        # Lowering-robustness fallback only: tiny W x (s*s*W) 0/1 replication matmul
        # (K = W stays small, so it is nowhere near MXU-bound on any generation).
        # TODO(synk): non-float dtypes on the fallback would need a non-MXU copy path.
        if not jnp.issubdtype(dtype, jnp.floating):
            raise
        k_idx = jax.lax.broadcasted_iota(jnp.int32, (W, w_out), 0)
        o_idx = jax.lax.broadcasted_iota(jnp.int32, (W, w_out), 1)
        rep = (k_idx == (o_idx % (W * s)) // s).astype(dtype)
        precision = (jax.lax.Precision.HIGHEST if dtype == jnp.float32
                     else jax.lax.Precision.DEFAULT)
        out2 = pl.pallas_call(
            functools.partial(_upsample_matmul_kernel, precision=precision),
            in_specs=[
                pl.BlockSpec((TM, W), lambda i: (i, 0)),
                pl.BlockSpec((W, w_out), lambda i: (0, 0)),
            ],
            cost_estimate=pl.CostEstimate(
                flops=2 * rows * W * w_out,
                transcendentals=0,
                bytes_accessed=(rows * (W + w_out) + W * w_out) * itemsize,
            ),
            **common,
        )(x2, rep)

    # Packed 2-D output is exactly the row-major NCHW output -> free reshape.
    return out2.reshape(B, C, H * s, W * s)


# ---------------------------------------------------------------------------
# Self-test
# ---------------------------------------------------------------------------

if __name__ == "__main__":
    def ref_upsample(a, s):
        # torch: view(B,C,H,1,W,1).expand(...,s,...,s).view(B,C,H*s,W*s)
        return jnp.repeat(jnp.repeat(a, s, axis=2), s, axis=3)

    # Primary case (matches the module's typical use): NCHW float32, stride=2.
    key = jax.random.PRNGKey(0)
    B, C, H, W, s = 2, 4, 16, 16, 2
    x = jax.random.normal(key, (B, C, H, W), dtype=jnp.float32)
    y = jax.block_until_ready(upsample(x, stride=s))
    assert y.shape == (B, C, H * s, W * s), y.shape
    assert y.dtype == x.dtype
    assert jnp.array_equal(y, ref_upsample(x, s))

    # Odd spatial size and a row count not divisible by the block -> partial block.
    x2 = jax.random.normal(jax.random.PRNGKey(1), (2, 3, 10, 13), dtype=jnp.float32)
    y2 = jax.block_until_ready(upsample(x2, stride=2))
    assert jnp.array_equal(y2, ref_upsample(x2, 2))

    # bfloat16 path (exact copy semantics, no precision games).
    xb = jax.random.normal(jax.random.PRNGKey(2), (2, 4, 16, 16), dtype=jnp.bfloat16)
    yb = jax.block_until_ready(upsample(xb, stride=2))
    assert yb.dtype == jnp.bfloat16
    assert jnp.array_equal(yb, ref_upsample(xb, 2))

    print("KERNEL_OK")
</pallas_src>

<mosaic_0001>
module attributes {stable_mosaic.version = 11 : i64} {
  func.func @_upsample_copy_kernel(%arg0: i32, %arg1: memref<32x16xf32, #tpu.memory_space<vmem>>, %arg2: memref<32x64xf32, #tpu.memory_space<vmem>>) attributes {dimension_semantics = [#tpu.dimension_semantics<parallel>], iteration_bounds = array<i64: 4>, scalar_prefetch = 0 : i64, scratch_operands = 0 : i64, tpu.core_type = #tpu.core_type<tc>, window_params = [{transform_indices = @transform_0, window_bounds = array<i64: 32, 16>}, {transform_indices = @transform_1, window_bounds = array<i64: 32, 64>}]} {
    %c0 = arith.constant 0 : index
    %c0_0 = arith.constant 0 : index
    %0 = vector.load %arg1[%c0, %c0_0] : memref<32x16xf32, #tpu.memory_space<vmem>>, vector<32x16xf32>
    %1 = vector.shape_cast %0 : vector<32x16xf32> to vector<32x16x1xf32>
    %2 = vector.broadcast %1 : vector<32x16x1xf32> to vector<32x16x2xf32>
    %3 = vector.shape_cast %2 : vector<32x16x2xf32> to vector<32x32xf32>
    %4 = tpu.concatenate %3, %3 in 1 : vector<32x32xf32>, vector<32x32xf32> -> vector<32x64xf32>
    %c0_1 = arith.constant 0 : index
    %c0_2 = arith.constant 0 : index
    %5 = vector.load %arg2[%c0_1, %c0_2] : memref<32x64xf32, #tpu.memory_space<vmem>>, vector<32x64xf32>
    tpu.vector_store %arg2[%c0_1, %c0_2], %4 {strides = array<i32>} : memref<32x64xf32, #tpu.memory_space<vmem>>, vector<32x64xf32>,
    return
  }
  func.func @transform_0(%arg0: i32) -> (i32, i32) {
    %c0_i32 = arith.constant 0 : i32
    %c0_i32_0 = arith.constant 0 : i32
    return %arg0, %c0_i32 : i32, i32
  }
  func.func @transform_1(%arg0: i32) -> (i32, i32) {
    %c0_i32 = arith.constant 0 : i32
    %c0_i32_0 = arith.constant 0 : i32
    return %arg0, %c0_i32 : i32, i32
  }
}

module attributes {stable_mosaic.version = 11 : i64} {
  func.func @_upsample_matmul_kernel(%arg0: i32, %arg1: memref<32x16xf32, #tpu.memory_space<vmem>>, %arg2: memref<16x64xf32, #tpu.memory_space<vmem>>, %arg3: memref<32x64xf32, #tpu.memory_space<vmem>>) attributes {dimension_semantics = [#tpu.dimension_semantics<parallel>], iteration_bounds = array<i64: 4>, scalar_prefetch = 0 : i64, scratch_operands = 0 : i64, tpu.core_type = #tpu.core_type<tc>, window_params = [{transform_indices = @transform_0, window_bounds = array<i64: 32, 16>}, {pipeline_mode = #tpu.pipeline_mode<synchronous>, transform_indices = @transform_1, window_bounds = array<i64: 16, 64>}, {transform_indices = @transform_2, window_bounds = array<i64: 32, 64>}]} {
    %c0 = arith.constant 0 : index
    %c0_0 = arith.constant 0 : index
    %0 = vector.load %arg1[%c0, %c0_0] : memref<32x16xf32, #tpu.memory_space<vmem>>, vector<32x16xf32>
    %c0_1 = arith.constant 0 : index
    %c0_2 = arith.constant 0 : index
    %1 = vector.load %arg2[%c0_1, %c0_2] : memref<16x64xf32, #tpu.memory_space<vmem>>, vector<16x64xf32>
    %cst = arith.constant dense<0.000000e+00> : vector<32x64xf32>
    %2 = tpu.matmul %0, %1, %cst {dimension_numbers = #tpu.dot_dimension_numbers<[1], [0], [0], [1], [0, 0, 1, 1], [], []>, precision = #tpu.contract_precision<fp32>} : vector<32x16xf32>, vector<16x64xf32>, vector<32x64xf32> -> vector<32x64xf32>
    %c0_3 = arith.constant 0 : index
    %c0_4 = arith.constant 0 : index
    %3 = vector.load %arg3[%c0_3, %c0_4] : memref<32x64xf32, #tpu.memory_space<vmem>>, vector<32x64xf32>
    tpu.vector_store %arg3[%c0_3, %c0_4], %2 {strides = array<i32>} : memref<32x64xf32, #tpu.memory_space<vmem>>, vector<32x64xf32>,
    return
  }
  func.func @transform_0(%arg0: i32) -> (i32, i32) {
    %c0_i32 = arith.constant 0 : i32
    %c0_i32_0 = arith.constant 0 : i32
    return %arg0, %c0_i32 : i32, i32
  }
  func.func @transform_1(%arg0: i32) -> (i32, i32) {
    %c0_i32 = arith.constant 0 : i32
    %c0_i32_0 = arith.constant 0 : i32
    %c0_i32_1 = arith.constant 0 : i32
    return %c0_i32, %c0_i32_0 : i32, i32
  }
  func.func @transform_2(%arg0: i32) -> (i32, i32) {
    %c0_i32 = arith.constant 0 : i32
    %c0_i32_0 = arith.constant 0 : i32
    return %arg0, %c0_i32 : i32, i32
  }
}

</mosaic_0001>

<bundles_post_ra>
// kernel: tpu_custom_call.1
= control target key start
LH: loop header
LB: loop body
LE: loop exit
PB: predicated region body
PF: predicated region fallthrough
CT: control target
= control target key end

     0   :  { %s2034_s6 = smov 0   ;;  %s2915_s0 = inlined_call_operand.vmem [shape: f32[128,16], index: 0, kind: input, shape index: {}]   ;;  %s2916_s1 = inlined_call_operand.vmem [shape: f32[128,64], index: 1, kind: output, shape index: {}]  }
   0x1 LB: > { %s1961_s7 = sadd.s32 4294967295, %s2004_s6   ;;  %p1965_p0 = scmp.ge.s32.totalorder %s2004_s6, 1  ;;  %s2004_s6 = sphi %s2034_s6, %s11_s6  }
   0x2   : > { %p88_p1 = scmp.lt.s32.totalorder %s2004_s6, 5 }
   0x4   : > { %p89_p2 = pnand %p1965_p0, %p88_p1 }
   0x6   : > { %92 = sbr.rel (%p89_p2) target bundleno = 580 (0x244), region = 24 }
   0xd   : > { %s1966_s8 = sshll.u32 %s1961_s7, 2  ;;  %v124_v0 = vlaneseq  ;;  %v2006_v56 = vmov 1983009808   ;;  %v2007_v61 = vmov 1934713408   ;;  %s2008_s13 = smov 2  }
   0xe   : > { %p109_p3 = scmp.lt.s32.totalorder %s1966_s8, 15  ;;  %v479_v57 = vunpack.c.l.s4 %v2006_v56  ;;  %v543_v62 = vunpack.c.l.s4 %v2007_v61  ;;  %s2009_s14 = smov 4   ;;  %vm1804_vm0 = vcmask 15360   ;;  %vm1809_vm1 = vcmask 31744  }
   0xf   : > { %v2042_v1 = vshrl.u32 %v124_v0, 7  ;;  %s2010_s15 = smov 6   ;;  %s2011_s16 = smov 8   ;;  %vm1814_vm2 = vcmask 48128   ;;  %vm1819_vm3 = vcmask 64512   ;;  %vm1824_vm4 = vcmask 80896  }
  0x10   : > { %s2964_s8 = smov (!%p109_p3, %s1966_s8), 15  ;;  %v480_v60 = vunpack.c.0.s8 %v479_v57  ;;  %s2012_s17 = smov 10   ;;  %vm1829_vm5 = vcmask 97280   ;;  %vm1834_vm6 = vcmask 113664   ;;  %vm1839_vm7 = vcmask 130048  }
  0x11   : > { %v2047_v2 = vsub.s32 1, %v2042_v1  ;;  %v2050_v3 = vsub.s32 0, %v2042_v1  ;;  %s1967_s9 = sshll.u32 %s2964_s8, 3  ;;  %v2064_v7 = vsub.s32 2, %v2042_v1  ;;  %v159_v9 = vsub.s32 3, %v2042_v1  ;;  %s2013_s18 = smov 12  }
  0x12   : > { %s2058_s12 = scalar_lea.vmem %s2915_s0, %s1967_s9  ;;  %v2071_v10 = vsub.s32 4, %v2042_v1  ;;  %v181_v11 = vsub.s32 5, %v2042_v1  ;;  %v2076_v13 = vsub.s32 6, %v2042_v1  ;;  %v203_v25 = vsub.s32 7, %v2042_v1  ;;  %s2014_s19 = smov 14  }
  0x13   : > { %v120_v4 = vld [vmem:[%s2058_s12] sm:$0xff]  ;;  %v2067_v8 = vld [vmem:[%s2058_s12 + $0x18] sm:$0xff]  ;;  %v121_v27 = vld [vmem:[%s2058_s12 + $0x8] sm:$0xff]  ;;  %s2015_s20 = smov 16   ;;  %s2016_s21 = smov 18   ;;  %vm1844_vm8 = vcmask 146432  }
  0x14   : > { %v138_v5 = vrot.slane %v120_v4, %v2047_v2  ;;  %v127_v6 = vrot.slane %v120_v4, %v2050_v3  ;;  %v149_v12 = vrot.slane %v120_v4, %v2064_v7  ;;  %v2080_v14 = vrot.slane %v2067_v8, %v2047_v2  ;;  %v122_v36 = vld [vmem:[%s2058_s12 + $0x10] sm:$0xff]  ;;  %s2017_s22 = smov 20   ;;  %s2018_s23 = smov 22  }
  0x15   : > { %v2084_v15 = vrot.slane %v2067_v8, %v2050_v3  ;;  %v2087_v16 = vrot.slane %v2067_v8, %v159_v9  ;;  %v2091_v17 = vrot.slane %v2067_v8, %v2064_v7  ;;  %v2094_v18 = vrot.slane %v2067_v8, %v181_v11  ;;  %s2019_s24 = smov 24   ;;  %s2020_s25 = smov 26  }
  0x16   : > { %140 = vbcast.lane.b32.xlu1 %v138_v5, 256  ;;  %129 = vbcast.lane.b32.xlu0 %v127_v6, 256  ;;  %v2098_v19 = vrot.slane %v2067_v8, %v2071_v10  ;;  %v2102_v20 = vrot.slane %v2067_v8, %v2076_v13  ;;  %v160_v21 = vrot.slane %v120_v4, %v159_v9  ;;  %s2021_s26 = smov 28   ;;  %s2022_s27 = smov 30   ;;  %vm1849_vm9 = vcmask 162816  }
  0x17   : > { %v171_v22 = vrot.slane %v120_v4, %v2071_v10  ;;  %v182_v23 = vrot.slane %v120_v4, %v181_v11  ;;  %v193_v24 = vrot.slane %v120_v4, %v2076_v13  ;;  %v204_v26 = vrot.slane %v120_v4, %v203_v25  ;;  %s2023_s28 = smov 32   ;;  %s118_s2 = scalar_lea.vmem %s2916_s1, %s1967_s9 }
  0x18   : > { %v215_v28 = vrot.slane %v121_v27, %v2050_v3  ;;  %v226_v29 = vrot.slane %v121_v27, %v2047_v2  ;;  %v237_v30 = vrot.slane %v121_v27, %v2064_v7  ;;  %v248_v31 = vrot.slane %v121_v27, %v159_v9 }
  0x19   : > { %v259_v32 = vrot.slane %v121_v27, %v2071_v10  ;;  %v270_v33 = vrot.slane %v121_v27, %v181_v11  ;;  %v292_v34 = vrot.slane %v121_v27, %v203_v25  ;;  %v281_v35 = vrot.slane %v121_v27, %v2076_v13 }
  0x1a   : > { %144 = vbcast.lane.b32.xlu1 %v138_v5, 264  ;;  %133 = vbcast.lane.b32.xlu0 %v127_v6, 264  ;;  %v314_v37 = vrot.slane %v122_v36, %v2047_v2  ;;  %v303_v38 = vrot.slane %v122_v36, %v2050_v3  ;;  %v336_v39 = vrot.slane %v122_v36, %v159_v9  ;;  %v544_v5 = vunpack.c.0.s8 %v543_v62 }
  0x1b   : > { %v325_v40 = vrot.slane %v122_v36, %v2064_v7  ;;  %v358_v41 = vrot.slane %v122_v36, %v181_v11  ;;  %v347_v42 = vrot.slane %v122_v36, %v2071_v10  ;;  %v380_v43 = vrot.slane %v122_v36, %v203_v25 }
  0x1c   : > { %v369_v44 = vrot.slane %v122_v36, %v2076_v13  ;;  %v468_v45 = vrot.slane %v2067_v8, %v203_v25  ;;  %v2165_v3 = vsub.s32 %v480_v60, %v2042_v1  ;;  %v2187_v13 = vsub.s32 %v544_v5, %v2042_v1 }
  0x1d   : > { %vm1854_vm10 = vcmask 179200   ;;  %vm1859_vm11 = vcmask 195584   ;;  %vm1864_vm12 = vcmask 211968   ;;  %vm1869_vm13 = vcmask 228352  }
  0x1e   : > { %155 = vbcast.lane.b32.xlu1 %v149_v12, 264  ;;  %151 = vbcast.lane.b32.xlu0 %v149_v12, 256  ;;  %vm1874_vm14 = vcmask 244736   ;;  %vm1895_vm15 = vcmask 261120  }
  0x22   : > { %166 = vbcast.lane.b32.xlu1 %v160_v21, 264  ;;  %162 = vbcast.lane.b32.xlu0 %v160_v21, 256 }
  0x26   : > { %177 = vbcast.lane.b32.xlu1 %v171_v22, 264  ;;  %173 = vbcast.lane.b32.xlu0 %v171_v22, 256 }
  0x2a   : > { %188 = vbcast.lane.b32.xlu1 %v182_v23, 264  ;;  %184 = vbcast.lane.b32.xlu0 %v182_v23, 256 }
  0x2e   : > { %199 = vbcast.lane.b32.xlu1 %v193_v24, 264  ;;  %195 = vbcast.lane.b32.xlu0 %v193_v24, 256 }
  0x32   : > { %210 = vbcast.lane.b32.xlu1 %v204_v26, 264  ;;  %206 = vbcast.lane.b32.xlu0 %v204_v26, 256 }
  0x36   : > { %221 = vbcast.lane.b32.xlu1 %v215_v28, 264  ;;  %217 = vbcast.lane.b32.xlu0 %v215_v28, 256 }
  0x3a   : > { %232 = vbcast.lane.b32.xlu1 %v226_v29, 264  ;;  %228 = vbcast.lane.b32.xlu0 %v226_v29, 256 }
  0x3e   : > { %243 = vbcast.lane.b32.xlu1 %v237_v30, 264  ;;  %239 = vbcast.lane.b32.xlu0 %v237_v30, 256 }
  0x42   : > { %254 = vbcast.lane.b32.xlu1 %v248_v31, 264  ;;  %250 = vbcast.lane.b32.xlu0 %v248_v31, 256 }
  0x46   : > { %265 = vbcast.lane.b32.xlu1 %v259_v32, 264  ;;  %261 = vbcast.lane.b32.xlu0 %v259_v32, 256 }
  0x4a   : > { %276 = vbcast.lane.b32.xlu1 %v270_v33, 264  ;;  %272 = vbcast.lane.b32.xlu0 %v270_v33, 256 }
  0x4e   : > { %294 = vbcast.lane.b32.xlu1 %v292_v34, 256  ;;  %283 = vbcast.lane.b32.xlu0 %v281_v35, 256 }
  0x52   : > { %316 = vbcast.lane.b32.xlu1 %v314_v37, 256  ;;  %305 = vbcast.lane.b32.xlu0 %v303_v38, 256 }
  0x56   : > { %338 = vbcast.lane.b32.xlu1 %v336_v39, 256  ;;  %327 = vbcast.lane.b32.xlu0 %v325_v40, 256 }
  0x5a   : > { %360 = vbcast.lane.b32.xlu1 %v358_v41, 256  ;;  %349 = vbcast.lane.b32.xlu0 %v347_v42, 256 }
  0x5e   : > { %382 = vbcast.lane.b32.xlu1 %v380_v43, 256  ;;  %371 = vbcast.lane.b32.xlu0 %v369_v44, 256 }
  0x62   : > { %404 = vbcast.lane.b32.xlu1 %v2080_v14, 256  ;;  %393 = vbcast.lane.b32.xlu0 %v2084_v15, 256 }
  0x66   : > { %426 = vbcast.lane.b32.xlu1 %v2087_v16, 256  ;;  %415 = vbcast.lane.b32.xlu0 %v2091_v17, 256 }
  0x6a   : > { %448 = vbcast.lane.b32.xlu1 %v2094_v18, 256  ;;  %437 = vbcast.lane.b32.xlu0 %v2098_v19, 256 }
  0x6e   : > { %470 = vbcast.lane.b32.xlu1 %v468_v45, 256  ;;  %459 = vbcast.lane.b32.xlu0 %v2102_v20, 256 }
  0x72   : > { %298 = vbcast.lane.b32.xlu1 %v292_v34, 264  ;;  %287 = vbcast.lane.b32.xlu0 %v281_v35, 264 }
  0x76   : > { %320 = vbcast.lane.b32.xlu1 %v314_v37, 264  ;;  %309 = vbcast.lane.b32.xlu0 %v303_v38, 264 }
  0x7a   : > { %342 = vbcast.lane.b32.xlu1 %v336_v39, 264  ;;  %331 = vbcast.lane.b32.xlu0 %v325_v40, 264 }
  0x7e   : > { %364 = vbcast.lane.b32.xlu1 %v358_v41, 264  ;;  %353 = vbcast.lane.b32.xlu0 %v347_v42, 264 }
  0x82   : > { %386 = vbcast.lane.b32.xlu1 %v380_v43, 264  ;;  %375 = vbcast.lane.b32.xlu0 %v369_v44, 264 }
  0x86   : > { %408 = vbcast.lane.b32.xlu1 %v2080_v14, 264  ;;  %397 = vbcast.lane.b32.xlu0 %v2084_v15, 264 }
  0x88   : > { %v2129_v46 = vpop.permute.xlu1 %140  ;;  %v2131_v47 = vpop.permute.xlu0 %129 }
  0x8a   : > { %430 = vbcast.lane.b32.xlu1 %v2087_v16, 264  ;;  %419 = vbcast.lane.b32.xlu0 %v2091_v17, 264 }
  0x8c   : > { %v2135_v48 = vpop.permute.xlu1 %144  ;;  %v2137_v49 = vpop.permute.xlu0 %133 }
  0x8e   : > { %452 = vbcast.lane.b32.xlu1 %v2094_v18, 264  ;;  %441 = vbcast.lane.b32.xlu0 %v2098_v19, 264 }
  0x90   : > { %v2141_v50 = vpop.permute.xlu1 %155  ;;  %v2143_v51 = vpop.permute.xlu0 %151 }
  0x91   : > { %v476_v4 = vcombine.low %v2131_v47, %v2143_v51 }
  0x92   : > { %474 = vbcast.lane.b32.xlu1 %v468_v45, 264  ;;  %463 = vbcast.lane.b32.xlu0 %v2102_v20, 264 }
  0x93   : > { %v2181_v11 = vrot.slane %v476_v4, %v2165_v3 }
  0x94   : > { %v2146_v52 = vpop.permute.xlu1 %166  ;;  %v2148_v53 = vpop.permute.xlu0 %162 }
  0x95   : > { %v492_v63 = vcombine.low %v2129_v46, %v2148_v53 }
  0x97   : > { %v2170_v6 = vrot.slane %v492_v63, %v2165_v3 }
  0x98   : > { %v2150_v54 = vpop.permute.xlu1 %177  ;;  %v2152_v55 = vpop.permute.xlu0 %173 }
  0x99   : > { %v540_v14 = vcombine.low %v2181_v11, %v2170_v6 }
  0x9b   : > { %v2205_v1 = vrot.slane %v540_v14, %v2187_v13 }
  0x9c   : > { %v2154_v58 = vpop.permute.xlu1 %188  ;;  %v2156_v59 = vpop.permute.xlu0 %184 }
  0x9d   : > { %2933 = vst [vmem:[#allocation4_spill] sm:$0xff] %v2205_v1 }
  0xa0   : > { %v2160_v0 = vpop.permute.xlu1 %199  ;;  %v2162_v2 = vpop.permute.xlu0 %195 }
  0xa1   : > { %v508_v7 = vcombine.low %v2152_v55, %v2162_v2 }
  0xa3   : > { %v2192_v15 = vrot.slane %v508_v7, %v2165_v3 }
  0xa4   : > { %v2174_v8 = vpop.permute.xlu1 %210  ;;  %v2176_v9 = vpop.permute.xlu0 %206 }
  0xa5   : > { %v524_v10 = vcombine.low %v2156_v59, %v2176_v9 }
  0xa7   : > { %v2184_v12 = vrot.slane %v524_v10, %v2165_v3 }
  0xa8   : > { %v2194_v16 = vpop.permute.xlu1 %221  ;;  %v2196_v17 = vpop.permute.xlu0 %217 }
  0xa9   : > { %2931 = vst [vmem:[#allocation2_spill] sm:$0xff] %v2194_v16  ;;  %v572_v18 = vcombine.low %v2192_v15, %v2184_v12 }
  0xab   : > { %v2208_v21 = vrot.slane %v572_v18, %v2187_v13 }
  0xac   : > { %v2200_v19 = vpop.permute.xlu1 %232  ;;  %v2202_v20 = vpop.permute.xlu0 %228 }
  0xad   : > { %2932 = vst [vmem:[#allocation3_spill] sm:$0xff] %v2200_v19  ;;  %2934 = vst [vmem:[#allocation5_spill] sm:$0xff] %v2208_v21  ;;  %v605_v22 = vcombine.high %v2205_v1, %v2208_v21 }
  0xaf   : > { %1568 = vrot.lane.b32.xlu0 %v605_v22, %s2008_s13 }
  0xb0   : > { %v2215_v24 = vpop.permute.xlu1 %243  ;;  %v2217_v25 = vpop.permute.xlu0 %239 }
  0xb1   : > { %2935 = vst [vmem:[#allocation6_spill] sm:$0xff] %v2215_v24  ;;  %v612_v33 = vcombine.low %v2196_v17, %v2217_v25 }
  0xb3   : > { %v2247_v39 = vrot.slane %v612_v33, %v2165_v3 }
  0xb4   : > { %v2219_v26 = vpop.permute.xlu1 %254  ;;  %v2221_v27 = vpop.permute.xlu0 %250 }
  0xb5   : > { %v628_v30 = vcombine.low %v2202_v20, %v2221_v27 }
  0xb7   : > { %v2236_v34 = vrot.slane %v628_v30, %v2165_v3 }
  0xb8   : > { %v2223_v28 = vpop.permute.xlu1 %265  ;;  %v2225_v29 = vpop.permute.xlu0 %261 }
  0xb9   : > { %v676_v42 = vcombine.low %v2247_v39, %v2236_v34 }
  0xbb   : > { %v2271_v61 = vrot.slane %v676_v42, %v2187_v13 }
  0xbc   : > { %v2229_v31 = vpop.permute.xlu1 %276  ;;  %v2231_v32 = vpop.permute.xlu0 %272 }
  0xbd   : > { %2937 = vst [vmem:[#allocation8_spill] sm:$0xff] %v2271_v61 }
  0xc0   : > { %v2238_v35 = vpop.permute.xlu1 %294  ;;  %v2240_v36 = vpop.permute.xlu0 %283 }
  0xc1   : > { %v660_v37 = vcombine.low %v2231_v32, %v2238_v35  ;;  %v644_v38 = vcombine.low %v2225_v29, %v2240_v36 }
  0xc3   : > { %v2250_v40 = vrot.slane %v660_v37, %v2165_v3  ;;  %v2253_v41 = vrot.slane %v644_v38, %v2165_v3 }
  0xc4   : > { %v2257_v43 = vpop.permute.xlu1 %316  ;;  %v2259_v44 = vpop.permute.xlu0 %305 }
  0xc5   : > { %v708_v45 = vcombine.low %v2253_v41, %v2250_v40 }
  0xc7   : > { %v2264_v56 = vrot.slane %v708_v45, %v2187_v13 }
  0xc8   : > { %v2266_v57 = vpop.permute.xlu1 %338  ;;  %v2268_v60 = vpop.permute.xlu0 %327 }
  0xc9   : > { %2936 = vst [vmem:[#allocation7_spill] sm:$0xff] %v2264_v56  ;;  %v741_v62 = vcombine.high %v2271_v61, %v2264_v56  ;;  %v764_v63 = vcombine.low %v2257_v43, %v2266_v57  ;;  %v748_v4 = vcombine.low %v2259_v44, %v2268_v60  ;;  %v541_v56 = vcombine.high %v2181_v11, %v2170_v6 }
  0xcb   : > { %1570 = vrot.lane.b32.xlu1 %v741_v62, %s2008_s13  ;;  %v772_v14 = vrot.slane %v764_v63, %v2165_v3  ;;  %v756_v18 = vrot.slane %v748_v4, %v2165_v3  ;;  %v573_v63 = vcombine.high %v2192_v15, %v2184_v12 }
  0xcc   : > { %v2280_v5 = vpop.permute.xlu1 %360  ;;  %v2282_v7 = vpop.permute.xlu0 %349 }
  0xcd   : > { %v812_v45 = vcombine.low %v756_v18, %v772_v14  ;;  %v587_v16 = vrot.slane %v573_v63, %v2187_v13  ;;  %v813_v6 = vcombine.high %v756_v18, %v772_v14  ;;  %v493_v14 = vcombine.high %v2129_v46, %v2148_v53 }
  0xd0   : > { %v383_v22 = vpop.permute.xlu1 %382  ;;  %v372_v30 = vpop.permute.xlu0 %371 }
  0xd1   : > { %v796_v33 = vcombine.low %v2280_v5, %v383_v22  ;;  %v780_v37 = vcombine.low %v2282_v7, %v372_v30 }
  0xd3   : > { %v804_v38 = vrot.slane %v796_v33, %v2165_v3  ;;  %v788_v42 = vrot.slane %v780_v37, %v2165_v3  ;;  %v2308_v37 = vrot.slane %v812_v45, %v2187_v13  ;;  %v525_v45 = vcombine.high %v2156_v59, %v2176_v9 }
  0xd4   : > { %v2292_v62 = vpop.permute.xlu1 %404  ;;  %v2294_v23 = vpop.permute.xlu0 %393  ;;  %v827_v9 = vrot.slane %v813_v6, %v2187_v13 }
  0xd5   : > { %v844_v10 = vcombine.low %v788_v42, %v804_v38  ;;  %2939 = vst [vmem:[#allocation10_spill] sm:$0xff] %v2308_v37  ;;  %v845_v21 = vcombine.high %v788_v42, %v804_v38  ;;  %v555_v38 = vrot.slane %v541_v56, %v2187_v13  ;;  %v509_v56 = vcombine.high %v2152_v55, %v2162_v2 }
  0xd6   : > { %v2351_v53 = vrot.slane %v525_v45, %v2165_v3  ;;  %v797_v55 = vcombine.high %v2280_v5, %v383_v22  ;;  %v781_v2 = vcombine.high %v2282_v7, %v372_v30  ;;  %v765_v45 = vcombine.high %v2257_v43, %v2266_v57 }
  0xd7   : > { %v2299_v4 = vrot.slane %v844_v10, %v2187_v13  ;;  %v606_v63 = vcombine.low %v555_v38, %v587_v16  ;;  %v859_v24 = vrot.slane %v845_v21, %v2187_v13  ;;  %v477_v21 = vcombine.high %v2131_v47, %v2143_v51 }
  0xd8   : > { %v2303_v61 = vpop.permute.xlu1 %426  ;;  %v2305_v33 = vpop.permute.xlu0 %415  ;;  %v2360_v51 = vrot.slane %v493_v14, %v2165_v3  ;;  %v2363_v42 = vrot.slane %v509_v56, %v2165_v3  ;;  %v749_v5 = vcombine.high %v2259_v44, %v2268_v60  ;;  %v709_v14 = vcombine.high %v2253_v41, %v2250_v40 }
  0xd9   : > { %2938 = vst [vmem:[#allocation9_spill] sm:$0xff] %v2299_v4  ;;  %v877_v1 = vcombine.high %v2308_v37, %v2299_v4  ;;  %v900_v12 = vcombine.low %v2292_v62, %v2303_v61  ;;  %v884_v15 = vcombine.low %v2294_v23, %v2305_v33  ;;  %v2375_v30 = vrot.slane %v477_v21, %v2165_v3 }
  0xda   : > { %v2382_v43 = vrot.slane %v797_v55, %v2165_v3  ;;  %v2385_v44 = vrot.slane %v781_v2, %v2165_v3  ;;  %v607_v57 = vcombine.high %v555_v38, %v587_v16  ;;  %v677_v60 = vcombine.high %v2247_v39, %v2236_v34 }
  0xdb   : > { %1572 = vrot.lane.b32.xlu0 %v877_v1, %s2008_s13  ;;  %v2329_v19 = vrot.slane %v900_v12, %v2165_v3  ;;  %v2332_v1 = vrot.slane %v884_v15, %v2165_v3  ;;  %v878_v15 = vcombine.low %v827_v9, %v859_v24  ;;  %v556_v40 = vcombine.low %v2375_v30, %v2360_v51 }
  0xdc   : > { %v2318_v11 = vpop.permute.xlu1 %448  ;;  %v2320_v10 = vpop.permute.xlu0 %437  ;;  %v2398_v41 = vrot.slane %v765_v45, %v2165_v3  ;;  %v2401_v55 = vrot.slane %v749_v5, %v2165_v3  ;;  %v723_v2 = vrot.slane %v709_v14, %v2187_v13 }
  0xdd   : > { %v948_v6 = vcombine.low %v2332_v1, %v2329_v19  ;;  %v949_v5 = vcombine.high %v2332_v1, %v2329_v19  ;;  %v645_v1 = vcombine.high %v2225_v29, %v2240_v36 }
  0xde   : > { %v828_v14 = vcombine.low %v2401_v55, %v2398_v41 }
  0xdf   : > { %1584 = vrot.lane.b32.xlu0 %v606_v63, %s2009_s14  ;;  %v2390_v21 = vrot.slane %v948_v6, %v2187_v13  ;;  %v879_v6 = vcombine.high %v827_v9, %v859_v24  ;;  %v564_v24 = vrot.slane %v556_v40, %v2187_v13  ;;  %v963_v40 = vrot.slane %v949_v5, %v2187_v13 }
  0xe0   : > { %v2339_v18 = vpop.permute.xlu1 %470  ;;  %v2341_v59 = vpop.permute.xlu0 %459  ;;  %v836_v29 = vrot.slane %v828_v14, %v2187_v13  ;;  %v885_v14 = vcombine.high %v2294_v23, %v2305_v33  ;;  %v589_v23 = vcombine.high %v2363_v42, %v2351_v53 }
  0xe1   : > { %v932_v12 = vcombine.low %v2318_v11, %v2339_v18  ;;  %v916_v46 = vcombine.low %v2320_v10, %v2341_v59  ;;  %2940 = vst [vmem:[#allocation11_spill] sm:$0xff] %v2390_v21 }
  0xe3   : > { %v940_v63 = vrot.slane %v932_v12, %v2165_v3  ;;  %v924_v47 = vrot.slane %v916_v46, %v2165_v3  ;;  %1588 = vrot.lane.b32.xlu0 %v878_v15, %s2009_s14  ;;  %v588_v12 = vcombine.low %v2363_v42, %v2351_v53  ;;  %v860_v15 = vcombine.low %v2385_v44, %v2382_v43 }
  0xe4   : > { %v2370_v7 = vpop.permute.xlu1 %298  ;;  %v2372_v22 = vpop.permute.xlu0 %287  ;;  %v861_v42 = vcombine.high %v2385_v44, %v2382_v43 }
  0xe5   : > { %v980_v56 = vcombine.low %v924_v47, %v940_v63  ;;  %v981_v39 = vcombine.high %v924_v47, %v940_v63  ;;  %v596_v45 = vrot.slane %v588_v12, %v2187_v13  ;;  %v661_v47 = vcombine.high %v2231_v32, %v2238_v35 }
  0xe6   : > { %v868_v32 = vrot.slane %v860_v15, %v2187_v13  ;;  %v629_v35 = vcombine.high %v2202_v20, %v2221_v27  ;;  %v2450_v20 = vrot.slane %v645_v1, %v2165_v3  ;;  %v933_v27 = vcombine.high %v2318_v11, %v2339_v18 }
  0xe7   : > { %v2393_v46 = vrot.slane %v980_v56, %v2187_v13  ;;  %1600 = vrot.lane.b32.xlu0 %v607_v57, %s2010_s15  ;;  %v691_v56 = vrot.slane %v677_v60, %v2187_v13  ;;  %v995_v57 = vrot.slane %v981_v39, %v2187_v13  ;;  %v608_v60 = vcombine.low %v564_v24, %v596_v45 }
  0xe8   : > { %v2404_v16 = vpop.permute.xlu1 %320  ;;  %v2406_v34 = vpop.permute.xlu0 %309  ;;  %v880_v15 = vcombine.low %v836_v29, %v868_v32  ;;  %v2457_v5 = vrot.slane %v629_v35, %v2165_v3  ;;  %v2488_v35 = vrot.slane %v885_v14, %v2165_v3  ;;  %v1036_v14 = vcombine.low %v2135_v48, %v2146_v52 }
  0xe9   : > { %2941 = vst [vmem:[#allocation12_spill] sm:$0xff] %v2393_v46  ;;  %v1013_v38 = vcombine.high %v2390_v21, %v2393_v46  ;;  %v742_v12 = vcombine.low %v691_v56, %v723_v2 }
  0xeb   : > { %1574 = vrot.lane.b32.xlu1 %v1013_v38, %s2008_s13  ;;  %1604 = vrot.lane.b32.xlu0 %v879_v6, %s2010_s15  ;;  %v613_v38 = vcombine.high %v2196_v17, %v2217_v25  ;;  %v2441_v6 = vrot.slane %v661_v47, %v2165_v3  ;;  %v917_v17 = vcombine.high %v2320_v10, %v2341_v59 }
  0xec   : > { %v2426_v9 = vpop.permute.xlu1 %342  ;;  %v2428_v19 = vpop.permute.xlu0 %331  ;;  %v1014_v25 = vcombine.low %v963_v40, %v995_v57  ;;  %v901_v47 = vcombine.high %v2292_v62, %v2303_v61  ;;  %v2471_v10 = vrot.slane %v933_v27, %v2165_v3  ;;  %v743_v61 = vcombine.high %v691_v56, %v723_v2 }
  0xed   : > { %v2465_v1 = vrot.slane %v613_v38, %v2165_v3  ;;  %v724_v11 = vcombine.low %v2450_v20, %v2441_v6  ;;  %v2474_v18 = vrot.slane %v917_v17, %v2165_v3  ;;  %v609_v62 = vcombine.high %v564_v24, %v596_v45 }
  0xee   : > { %v557_v2 = vcombine.high %v2375_v30, %v2360_v51  ;;  %v1015_v45 = vcombine.high %v963_v40, %v995_v57  ;;  %v881_v24 = vcombine.high %v836_v29, %v868_v32  ;;  %v603_v38 = vrot.slane %v589_v23, %v2187_v13 }
  0xef   : > { %1586 = vrot.lane.b32.xlu1 %v742_v12, %s2009_s14  ;;  %1616 = vrot.lane.b32.xlu0 %v608_v60, %s2011_s16  ;;  %v692_v12 = vcombine.low %v2465_v1, %v2457_v5  ;;  %v2485_v60 = vrot.slane %v901_v47, %v2165_v3  ;;  %v996_v53 = vcombine.low %v2474_v18, %v2471_v10 }
  0xf0   : > { %v2445_v36 = vpop.permute.xlu1 %364  ;;  %v2447_v39 = vpop.permute.xlu0 %353  ;;  %v732_v56 = vrot.slane %v724_v11, %v2187_v13  ;;  %v829_v27 = vcombine.high %v2401_v55, %v2398_v41  ;;  %v571_v43 = vrot.slane %v557_v2, %v2187_v13  ;;  %v1068_v32 = vcombine.low %v2154_v58, %v2174_v8 }
  0xf1   : > { %v964_v51 = vcombine.low %v2488_v35, %v2485_v60  ;;  %v700_v30 = vrot.slane %v692_v12, %v2187_v13  ;;  %v875_v41 = vrot.slane %v861_v42, %v2187_v13  ;;  %v1004_v55 = vrot.slane %v996_v53, %v2187_v13 }
  0xf2   : > { %v610_v29 = vcombine.low %v571_v43, %v603_v38  ;;  %v1052_v17 = vcombine.low %v2150_v54, %v2160_v0  ;;  %v1020_v47 = vcombine.low %v2137_v49, %v2141_v50  ;;  %v2527_v11 = vrot.slane %v1068_v32, %v2165_v3 }
  0xf3   : > { %1590 = vrot.lane.b32.xlu1 %v1014_v25, %s2009_s14  ;;  %1620 = vrot.lane.b32.xlu0 %v880_v15, %s2011_s16  ;;  %v744_v40 = vcombine.low %v700_v30, %v732_v56  ;;  %v843_v25 = vrot.slane %v829_v27, %v2187_v13  ;;  %v972_v15 = vrot.slane %v964_v51, %v2187_v13 }
  0xf4   : > { %v2478_v33 = vpop.permute.xlu1 %386  ;;  %v2480_v59 = vpop.permute.xlu0 %375  ;;  %v1292_v12 = vcombine.low %v2406_v34, %v2428_v19  ;;  %v2546_v27 = vrot.slane %v1020_v47, %v2165_v3  ;;  %v2549_v51 = vrot.slane %v1036_v14, %v2165_v3  ;;  %v745_v63 = vcombine.high %v700_v30, %v732_v56 }
  0xf5   : > { %v1016_v23 = vcombine.low %v972_v15, %v1004_v55  ;;  %v1340_v2 = vcombine.low %v2445_v36, %v2478_v33  ;;  %v1324_v42 = vcombine.low %v2447_v39, %v2480_v59  ;;  %v1017_v30 = vcombine.high %v972_v15, %v1004_v55 }
  0xf6   : > { %v1204_v55 = vcombine.low %v2229_v31, %v2370_v7  ;;  %v1188_v15 = vcombine.low %v2223_v28, %v2372_v22 }
  0xf7   : > { %1602 = vrot.lane.b32.xlu1 %v743_v61, %s2010_s15  ;;  %1632 = vrot.lane.b32.xlu0 %v609_v62, %s2012_s17  ;;  %v882_v61 = vcombine.low %v843_v25, %v875_v41  ;;  %v1308_v62 = vcombine.low %v2404_v16, %v2426_v9  ;;  %v2563_v47 = vrot.slane %v1340_v2, %v2165_v3 }
  0xf8   : > { %v2508_v44 = vpop.permute.xlu1 %408  ;;  %v2510_v57 = vpop.permute.xlu0 %397  ;;  %v2566_v14 = vrot.slane %v1324_v42, %v2165_v3  ;;  %v2613_v46 = vrot.slane %v1188_v15, %v2165_v3 }
  0xfb   : > { %1606 = vrot.lane.b32.xlu1 %v1015_v45, %s2010_s15  ;;  %1636 = vrot.lane.b32.xlu0 %v881_v24, %s2012_s17  ;;  %v2542_v24 = vrot.slane %v1052_v17, %v2165_v3  ;;  %v2557_v17 = vrot.slane %v1308_v62, %v2165_v3 }
  0xfc   : > { %v2537_v53 = vpop.permute.xlu1 %430  ;;  %v2539_v45 = vpop.permute.xlu0 %419 }
  0xfd   : > { %v1116_v32 = vcombine.low %v2542_v24, %v2527_v11 }
  0xff   : > { %1618 = vrot.lane.b32.xlu1 %v744_v40, %s2011_s16  ;;  %1648 = vrot.lane.b32.xlu0 %v610_v29, %s2013_s18  ;;  %v725_v40 = vcombine.high %v2450_v20, %v2441_v6  ;;  %v611_v29 = vcombine.high %v571_v43, %v603_v38  ;;  %v1084_v6 = vcombine.low %v2546_v27, %v2549_v51 }
 0x100   : > { %v997_v20 = vcombine.high %v2474_v18, %v2471_v10  ;;  %v2576_v56 = vpop.permute.xlu1 %452  ;;  %v2578_v38 = vpop.permute.xlu0 %441  ;;  %v1124_v43 = vrot.slane %v1116_v32, %v2187_v13  ;;  %v1388_v10 = vcombine.low %v2566_v14, %v2563_v47  ;;  %v883_v18 = vcombine.high %v843_v25, %v875_v41 }
 0x101   : > { %2942 = vst [vmem:[#allocation13_spill] sm:$0xff] %v2576_v56  ;;  %2943 = vst [vmem:[#allocation14_spill] sm:$0xff] %v2578_v38 }
 0x103   : > { %1622 = vrot.lane.b32.xlu1 %v1016_v23, %s2011_s16  ;;  %1652 = vrot.lane.b32.xlu0 %v882_v61, %s2013_s18  ;;  %v2560_v23 = vrot.slane %v1292_v12, %v2165_v3  ;;  %v693_v61 = vcombine.high %v2465_v1, %v2457_v5  ;;  %v739_v5 = vrot.slane %v725_v40, %v2187_v13 }
 0x104   : > { %v2597_v2 = vpop.permute.xlu1 %474  ;;  %v2599_v41 = vpop.permute.xlu0 %463  ;;  %v1396_v40 = vrot.slane %v1388_v10, %v2187_v13  ;;  %v1428_v10 = vcombine.low %v2510_v57, %v2539_v45 }
 0x105   : > { %v1356_v1 = vcombine.low %v2560_v23, %v2557_v17  ;;  %v707_v62 = vrot.slane %v693_v61, %v2187_v13  ;;  %2944 = vst [vmem:[#allocation15_spill] sm:$0xff] %v2599_v41 }
 0x107   : > { %1634 = vrot.lane.b32.xlu1 %v745_v63, %s2012_s17  ;;  %1664 = vrot.lane.b32.xlu0 %v611_v29, %s2014_s19  ;;  %v965_v63 = vcombine.high %v2488_v35, %v2485_v60  ;;  %v1092_v60 = vrot.slane %v1084_v6, %v2187_v13  ;;  %v1011_v35 = vrot.slane %v997_v20, %v2187_v13  ;;  %v2945_v29 = vld [vmem:[#allocation3_spill] sm:$0xff]  ;;  %v2946_v6 = vld [vmem:[#allocation6_spill] sm:$0xff] }
 0x108   : > { %v746_v12 = vcombine.low %v707_v62, %v739_v5  ;;  %v1364_v32 = vrot.slane %v1356_v1, %v2187_v13  ;;  %v1172_v61 = vcombine.low %v2945_v29, %v2219_v26  ;;  %v1444_v1 = vcombine.low %v2508_v44, %v2537_v53 }
 0x109   : > { %v1148_v25 = vcombine.low %v1092_v60, %v1124_v43  ;;  %v979_v42 = vrot.slane %v965_v63, %v2187_v13  ;;  %v747_v37 = vcombine.high %v707_v62, %v739_v5  ;;  %v1085_v5 = vcombine.high %v2546_v27, %v2549_v51 }
 0x10a   : > { %v1420_v21 = vcombine.low %v1364_v32, %v1396_v40  ;;  %v2625_v15 = vrot.slane %v1172_v61, %v2165_v3 }
 0x10b   : > { %1638 = vrot.lane.b32.xlu1 %v1017_v30, %s2012_s17  ;;  %1668 = vrot.lane.b32.xlu0 %v883_v18, %s2014_s19  ;;  %v2947_v30 = vld [vmem:[#allocation2_spill] sm:$0xff]  ;;  %v2610_v18 = vrot.slane %v1204_v55, %v2165_v3  ;;  %v1018_v63 = vcombine.low %v979_v42, %v1011_v35  ;;  %v1460_v55 = vcombine.low %v2578_v38, %v2599_v41 }
 0x10c   : > { %v1156_v20 = vcombine.low %v2947_v30, %v2946_v6  ;;  %v2638_v38 = vrot.slane %v1428_v10, %v2165_v3  ;;  %v1149_v41 = vcombine.high %v1092_v60, %v1124_v43  ;;  %v1019_v10 = vcombine.high %v979_v42, %v1011_v35 }
 0x10d   : > { %v1252_v4 = vcombine.low %v2613_v46, %v2610_v18  ;;  %v1421_v43 = vcombine.high %v1364_v32, %v1396_v40  ;;  %v1099_v60 = vrot.slane %v1085_v5, %v2187_v13  ;;  %v1053_v42 = vcombine.high %v2150_v54, %v2160_v0 }
 0x10e   : > { %v1021_v32 = vcombine.high %v2137_v49, %v2141_v50  ;;  %v1309_v40 = vcombine.high %v2404_v16, %v2426_v9  ;;  %v1293_v54 = vcombine.high %v2406_v34, %v2428_v19  ;;  %v1341_v49 = vcombine.high %v2445_v36, %v2478_v33 }
 0x10f   : > { %1650 = vrot.lane.b32.xlu1 %v746_v12, %s2013_s18  ;;  %1680 = vrot.lane.b32.xlu0 %v1148_v25, %s2015_s20  ;;  %v1476_v12 = vcombine.low %v2576_v56, %v2597_v2  ;;  %v2629_v25 = vrot.slane %v1156_v20, %v2165_v3  ;;  %v2635_v56 = vrot.slane %v1444_v1, %v2165_v3 }
 0x110   : > { %v1117_v20 = vcombine.high %v2542_v24, %v2527_v11  ;;  %v1260_v11 = vrot.slane %v1252_v4, %v2187_v13  ;;  %v1357_v24 = vcombine.high %v2560_v23, %v2557_v17  ;;  %v1069_v4 = vcombine.high %v2154_v58, %v2174_v8 }
 0x111   : > { %v2641_v61 = vrot.slane %v1476_v12, %v2165_v3  ;;  %v1492_v62 = vcombine.low %v2638_v38, %v2635_v56  ;;  %v1037_v58 = vcombine.high %v2135_v48, %v2146_v52  ;;  %v1325_v48 = vcombine.high %v2447_v39, %v2480_v59 }
 0x112   : > { %v1131_v27 = vrot.slane %v1117_v20, %v2187_v13  ;;  %v2683_v8 = vrot.slane %v1069_v4, %v2165_v3  ;;  %v2694_v0 = vrot.slane %v1053_v42, %v2165_v3  ;;  %v2949_v20 = vld [vmem:[#allocation5_spill] sm:$0xff]  ;;  %v2704_v34 = vrot.slane %v1021_v32, %v2165_v3  ;;  %v2953_v42 = vld [vmem:[#allocation14_spill] sm:$0xff] }
 0x113   : > { %1654 = vrot.lane.b32.xlu1 %v1018_v63, %s2013_s18  ;;  %1684 = vrot.lane.b32.xlu0 %v1420_v21, %s2015_s20  ;;  %v2644_v63 = vrot.slane %v1460_v55, %v2165_v3  ;;  %v1220_v21 = vcombine.low %v2629_v25, %v2625_v15  ;;  %v1500_v17 = vrot.slane %v1492_v62, %v2187_v13  ;;  %v2948_v55 = vld [vmem:[#allocation4_spill] sm:$0xff] }
 0x114   : > { %v2707_v9 = vrot.slane %v1037_v58, %v2165_v3  ;;  %v1132_v19 = vcombine.low %v2694_v0, %v2683_v8  ;;  %v1253_v36 = vcombine.high %v2613_v46, %v2610_v18  ;;  %v1151_v39 = vcombine.high %v1099_v60, %v1131_v27 }
 0x115   : > { %v1524_v1 = vcombine.low %v2644_v63, %v2641_v61  ;;  %v1228_v51 = vrot.slane %v1220_v21, %v2187_v13  ;;  %v2950_v21 = vcombine.low %v2948_v55, %v2949_v20  ;;  %v2715_v59 = vrot.slane %v1309_v40, %v2165_v3 }
 0x116   : > { %v2718_v5 = vrot.slane %v1293_v54, %v2165_v3  ;;  %v2721_v62 = vrot.slane %v1341_v49, %v2165_v3  ;;  %v1100_v46 = vcombine.low %v2704_v34, %v2707_v9  ;;  %v1267_v18 = vrot.slane %v1253_v36, %v2187_v13 }
 0x117   : > { %1666 = vrot.lane.b32.xlu1 %v747_v37, %s2014_s19  ;;  %1696 = vrot.lane.b32.xlu0 %v1149_v41, %s2016_s21  ;;  %v1389_v37 = vcombine.high %v2566_v14, %v2563_v47  ;;  %v1284_v35 = vcombine.low %v1228_v51, %v1260_v11  ;;  %v1532_v23 = vrot.slane %v1524_v1, %v2187_v13 }
 0x118   : > { %v1371_v47 = vrot.slane %v1357_v24, %v2187_v13  ;;  %v1150_v41 = vcombine.low %v1099_v60, %v1131_v27  ;;  %v1285_v33 = vcombine.high %v1228_v51, %v1260_v11  ;;  %v2724_v1 = vrot.slane %v1325_v48, %v2165_v3 }
 0x119   : > { %v1403_v14 = vrot.slane %v1389_v37, %v2187_v13  ;;  %v1556_v12 = vcombine.low %v1500_v17, %v1532_v23  ;;  %v1493_v11 = vcombine.high %v2638_v38, %v2635_v56  ;;  %v1525_v24 = vcombine.high %v2644_v63, %v2641_v61 }
 0x11a   : > { %v1557_v37 = vcombine.high %v1500_v17, %v1532_v23  ;;  %v1140_v27 = vrot.slane %v1132_v19, %v2187_v13  ;;  %v1205_v56 = vcombine.high %v2229_v31, %v2370_v7  ;;  %v1189_v38 = vcombine.high %v2223_v28, %v2372_v22 }
 0x11b   : > { %1670 = vrot.lane.b32.xlu1 %v1019_v10, %s2014_s19  ;;  %1700 = vrot.lane.b32.xlu0 %v1421_v43, %s2016_s21  ;;  %v1422_v52 = vcombine.low %v1371_v47, %v1403_v14  ;;  %v1221_v10 = vcombine.high %v2629_v25, %v2625_v15  ;;  %v1372_v15 = vcombine.low %v2718_v5, %v2715_v59 }
 0x11c   : > { %v1404_v25 = vcombine.low %v2724_v1, %v2721_v62  ;;  %v1423_v43 = vcombine.high %v1371_v47, %v1403_v14  ;;  %v1108_v61 = vrot.slane %v1100_v46, %v2187_v13  ;;  %v1507_v63 = vrot.slane %v1493_v11, %v2187_v13  ;;  %v2955_v46 = vld [vmem:[#allocation7_spill] sm:$0xff] }
 0x11d   : > { %v1235_v51 = vrot.slane %v1221_v10, %v2187_v13  ;;  %v1539_v60 = vrot.slane %v1525_v24, %v2187_v13  ;;  %v1173_v31 = vcombine.high %v2945_v29, %v2219_v26  ;;  %v1157_v28 = vcombine.high %v2947_v30, %v2946_v6  ;;  %v2951_v26 = vld [vmem:[#allocation13_spill] sm:$0xff]  ;;  %v2954_v10 = vld [vmem:[#allocation8_spill] sm:$0xff] }
 0x11e   : > { %v1412_v17 = vrot.slane %v1404_v25, %v2187_v13  ;;  %v1152_v23 = vcombine.low %v1108_v61, %v1140_v27  ;;  %v1219_v7 = vrot.slane %v1205_v56, %v2165_v3  ;;  %v1203_v22 = vrot.slane %v1189_v38, %v2165_v3 }
 0x11f   : > { %1682 = vrot.lane.b32.xlu1 %v1284_v35, %s2015_s20  ;;  %1712 = vrot.lane.b32.xlu0 %v1150_v41, %s2017_s22  ;;  %v1286_v4 = vcombine.low %v1235_v51, %v1267_v18  ;;  %v1380_v35 = vrot.slane %v1372_v15, %v2187_v13  ;;  %v1445_v47 = vcombine.high %v2508_v44, %v2537_v53  ;;  %v2952_v41 = vld [vmem:[#allocation15_spill] sm:$0xff] }
 0x120   : > { %v1429_v14 = vcombine.high %v2510_v57, %v2539_v45  ;;  %v1477_v29 = vcombine.high %v2951_v26, %v2597_v2  ;;  %v1461_v32 = vcombine.high %v2953_v42, %v2952_v41  ;;  %v1558_v6 = vcombine.low %v1507_v63, %v1539_v60 }
 0x121   : > { %v1569_v50 = vpop.permute.xlu0 %1568  ;;  %v1424_v30 = vcombine.low %v1380_v35, %v1412_v17  ;;  %v1187_v58 = vrot.slane %v1173_v31, %v2165_v3  ;;  %v1171_v44 = vrot.slane %v1157_v28, %v2165_v3  ;;  %v1268_v53 = vcombine.low %v1203_v22, %v1219_v7  ;;  %v2957_v31 = vld [vmem:[#allocation10_spill] sm:$0xff]  ;;  %v2958_v28 = vld [vmem:[#allocation9_spill] sm:$0xff] }
 0x122   : > { %v2700_v16 = vsel %vm1804_vm0, %v2950_v21, %v1569_v50  ;;  %v1287_v40 = vcombine.high %v1235_v51, %v1267_v18  ;;  %v1459_v57 = vrot.slane %v1445_v47, %v2165_v3  ;;  %v1443_v45 = vrot.slane %v1429_v14, %v2165_v3 }
 0x123   : > { %1686 = vrot.lane.b32.xlu1 %v1556_v12, %s2015_s20  ;;  %1716 = vrot.lane.b32.xlu0 %v1422_v52, %s2017_s22  ;;  %v1491_v2 = vrot.slane %v1477_v29, %v2165_v3  ;;  %v1475_v12 = vrot.slane %v1461_v32, %v2165_v3  ;;  %v1133_v54 = vcombine.high %v2694_v0, %v2683_v8 }
 0x124   : > { %v1153_v49 = vcombine.high %v1108_v61, %v1140_v27  ;;  %v1236_v48 = vcombine.low %v1171_v44, %v1187_v58  ;;  %v1101_v50 = vcombine.high %v2704_v34, %v2707_v9  ;;  %v1276_v52 = vrot.slane %v1268_v53, %v2187_v13 }
 0x125   : > { %v1508_v55 = vcombine.low %v1443_v45, %v1459_v57  ;;  %v1540_v20 = vcombine.low %v1475_v12, %v1491_v2  ;;  %v1559_v21 = vcombine.high %v1507_v63, %v1539_v60  ;;  %v1373_v3 = vcombine.high %v2718_v5, %v2715_v59 }
 0x126   : > { %v1405_v8 = vcombine.high %v2724_v1, %v2721_v62  ;;  %v1425_v0 = vcombine.high %v1380_v35, %v1412_v17  ;;  %v1147_v19 = vrot.slane %v1133_v54, %v2187_v13  ;;  %v1244_v34 = vrot.slane %v1236_v48, %v2187_v13 }
 0x127   : > { %1698 = vrot.lane.b32.xlu1 %v1285_v33, %s2016_s21  ;;  %1728 = vrot.lane.b32.xlu0 %v1151_v39, %s2018_s23  ;;  %v1115_v9 = vrot.slane %v1101_v50, %v2187_v13  ;;  %v1516_v36 = vrot.slane %v1508_v55, %v2187_v13  ;;  %v1548_v39 = vrot.slane %v1540_v20, %v2187_v13 }
 0x128   : > { %v1288_v33 = vcombine.low %v1244_v34, %v1276_v52  ;;  %v1387_v59 = vrot.slane %v1373_v3, %v2187_v13  ;;  %v1419_v5 = vrot.slane %v1405_v8, %v2187_v13  ;;  %v2956_v18 = vcombine.low %v2954_v10, %v2955_v46 }
 0x129   : > { %v1154_v1 = vcombine.low %v1115_v9, %v1147_v19  ;;  %v1560_v24 = vcombine.low %v1516_v36, %v1548_v39  ;;  %v1269_v15 = vcombine.high %v1203_v22, %v1219_v7  ;;  %v1289_v25 = vcombine.high %v1244_v34, %v1276_v52 }
 0x12a   : > { %v1237_v27 = vcombine.high %v1171_v44, %v1187_v58  ;;  %v1509_v56 = vcombine.high %v1443_v45, %v1459_v57  ;;  %v1541_v38 = vcombine.high %v1475_v12, %v1491_v2  ;;  %v1561_v61 = vcombine.high %v1516_v36, %v1548_v39  ;;  %v2960_v58 = vld [vmem:[#allocation11_spill] sm:$0xff]  ;;  %v2961_v44 = vld [vmem:[#allocation12_spill] sm:$0xff] }
 0x12b   : > { %1702 = vrot.lane.b32.xlu1 %v1557_v37, %s2016_s21  ;;  %1732 = vrot.lane.b32.xlu0 %v1423_v43, %s2018_s23  ;;  %v1426_v37 = vcombine.low %v1387_v59, %v1419_v5  ;;  %v1155_v43 = vcombine.high %v1115_v9, %v1147_v19  ;;  %v1283_v51 = vrot.slane %v1269_v15, %v2187_v13 }
 0x12c   : > { %v1427_v63 = vcombine.high %v1387_v59, %v1419_v5  ;;  %v1251_v60 = vrot.slane %v1237_v27, %v2187_v13  ;;  %v1555_v35 = vrot.slane %v1541_v38, %v2187_v13  ;;  %v2959_v7 = vcombine.low %v2957_v31, %v2958_v28 }
 0x12d   : > { %v2962_v53 = vcombine.low %v2960_v58, %v2961_v44 }
 0x12e   : > { %v1290_v17 = vcombine.low %v1251_v60, %v1283_v51  ;;  %v1291_v29 = vcombine.high %v1251_v60, %v1283_v51 }
 0x12f   : > { %1714 = vrot.lane.b32.xlu1 %v1286_v4, %s2017_s22  ;;  %1744 = vrot.lane.b32.xlu0 %v1152_v23, %s2019_s24  ;;  %v1523_v4 = vrot.slane %v1509_v56, %v2187_v13 }
 0x131   : > { %v1562_v47 = vcombine.low %v1523_v4, %v1555_v35  ;;  %v1563_v42 = vcombine.high %v1523_v4, %v1555_v35 }
 0x133   : > { %1718 = vrot.lane.b32.xlu1 %v1558_v6, %s2017_s22  ;;  %1748 = vrot.lane.b32.xlu0 %v1424_v30, %s2019_s24 }
 0x137   : > { %1730 = vrot.lane.b32.xlu1 %v1287_v40, %s2018_s23  ;;  %1760 = vrot.lane.b32.xlu0 %v1153_v49, %s2020_s25 }
 0x13b   : > { %1734 = vrot.lane.b32.xlu1 %v1559_v21, %s2018_s23  ;;  %1764 = vrot.lane.b32.xlu0 %v1425_v0, %s2020_s25 }
 0x13d   : > { %v1571_v62 = vpop.permute.xlu1 %1570 }
 0x13e   : > { %v1806_v11 = vsel %vm1804_vm0, %v2956_v18, %v1571_v62 }
 0x13f   : > { %1746 = vrot.lane.b32.xlu1 %v1288_v33, %s2019_s24  ;;  %1776 = vrot.lane.b32.xlu0 %v1154_v1, %s2021_s26 }
 0x143   : > { %1750 = vrot.lane.b32.xlu1 %v1560_v24, %s2019_s24  ;;  %1780 = vrot.lane.b32.xlu0 %v1426_v37, %s2021_s26 }
 0x147   : > { %1762 = vrot.lane.b32.xlu1 %v1289_v25, %s2020_s25  ;;  %1792 = vrot.lane.b32.xlu0 %v1155_v43, %s2022_s27 }
 0x14b   : > { %1766 = vrot.lane.b32.xlu1 %v1561_v61, %s2020_s25  ;;  %1796 = vrot.lane.b32.xlu0 %v1427_v63, %s2022_s27 }
 0x14d   : > { %v1573_v23 = vpop.permute.xlu0 %1572 }
 0x14e   : > { %v1807_v22 = vsel %vm1804_vm0, %v2959_v7, %v1573_v23 }
 0x14f   : > { %1778 = vrot.lane.b32.xlu1 %v1290_v17, %s2021_s26 }
 0x151   : > { %v1585_v14 = vpop.permute.xlu0 %1584 }
 0x152   : > { %v1810_v26 = vsel %vm1809_vm1, %v2700_v16, %v1585_v14 }
 0x153   : > { %1782 = vrot.lane.b32.xlu1 %v1562_v47, %s2021_s26 }
 0x155   : > { %v1589_v41 = vpop.permute.xlu0 %1588 }
 0x156   : > { %v1812_v13 = vsel %vm1809_vm1, %v1807_v22, %v1589_v41 }
 0x157   : > { %1794 = vrot.lane.b32.xlu1 %v1291_v29, %s2022_s27 }
 0x159   : > { %v1601_v32 = vpop.permute.xlu0 %1600 }
 0x15a   : > { %v1815_v6 = vsel %vm1814_vm2, %v1810_v26, %v1601_v32 }
 0x15b   : > { %1798 = vrot.lane.b32.xlu1 %v1563_v42, %s2022_s27 }
 0x15d   : > { %v1575_v30 = vpop.permute.xlu1 %1574  ;;  %v1605_v16 = vpop.permute.xlu0 %1604 }
 0x15e   : > { %v1808_v40 = vsel %vm1804_vm0, %v2962_v53, %v1575_v30  ;;  %v1817_v57 = vsel %vm1814_vm2, %v1812_v13, %v1605_v16  ;;  %vm1900_vm0 = vcmask 523264  }
 0x161   : > { %v1587_v45 = vpop.permute.xlu1 %1586  ;;  %v1617_v12 = vpop.permute.xlu0 %1616 }
 0x162   : > { %v1811_v2 = vsel %vm1809_vm1, %v1806_v11, %v1587_v45  ;;  %v1820_v54 = vsel %vm1819_vm3, %v1815_v6, %v1617_v12 }
 0x165   : > { %v1591_v49 = vpop.permute.xlu1 %1590  ;;  %v1621_v50 = vpop.permute.xlu0 %1620 }
 0x166   : > { %v1813_v48 = vsel %vm1809_vm1, %v1808_v40, %v1591_v49  ;;  %v1822_v52 = vsel %vm1819_vm3, %v1817_v57, %v1621_v50 }
 0x169   : > { %v1603_v55 = vpop.permute.xlu1 %1602  ;;  %v1633_v21 = vpop.permute.xlu0 %1632 }
 0x16a   : > { %v1816_v20 = vsel %vm1814_vm2, %v1811_v2, %v1603_v55  ;;  %v1825_v3 = vsel %vm1824_vm4, %v1820_v54, %v1633_v21 }
 0x16d   : > { %v1607_v8 = vpop.permute.xlu1 %1606  ;;  %v1637_v19 = vpop.permute.xlu0 %1636 }
 0x16e   : > { %v1818_v0 = vsel %vm1814_vm2, %v1813_v48, %v1607_v8  ;;  %v1827_v34 = vsel %vm1824_vm4, %v1822_v52, %v1637_v19 }
 0x171   : > { %v1619_v9 = vpop.permute.xlu1 %1618  ;;  %v1649_v39 = vpop.permute.xlu0 %1648 }
 0x172   : > { %v1821_v36 = vsel %vm1819_vm3, %v1816_v20, %v1619_v9  ;;  %v1830_v13 = vsel %vm1829_vm5, %v1825_v3, %v1649_v39 }
 0x175   : > { %v1623_v33 = vpop.permute.xlu1 %1622  ;;  %v1653_v5 = vpop.permute.xlu0 %1652 }
 0x176   : > { %v1823_v59 = vsel %vm1819_vm3, %v1818_v0, %v1623_v33  ;;  %v1832_v44 = vsel %vm1829_vm5, %v1827_v34, %v1653_v5 }
 0x179   : > { %v1635_v62 = vpop.permute.xlu1 %1634  ;;  %v1665_v10 = vpop.permute.xlu0 %1664 }
 0x17a   : > { %v2838_v1 = vsel %vm1824_vm4, %v1821_v36, %v1635_v62  ;;  %v1835_v32 = vsel %vm1834_vm6, %v1830_v13, %v1665_v10 }
 0x17d   : > { %v1639_v46 = vpop.permute.xlu1 %1638  ;;  %v1669_v11 = vpop.permute.xlu0 %1668 }
 0x17e   : > { %v2841_v18 = vsel %vm1824_vm4, %v1823_v59, %v1639_v46  ;;  %v1837_v16 = vsel %vm1834_vm6, %v1832_v44, %v1669_v11 }
 0x181   : > { %v2843_v24 = vpop.permute.xlu1 %1650  ;;  %v1681_v37 = vpop.permute.xlu0 %1680 }
 0x182   : > { %v1840_v6 = vsel %vm1839_vm7, %v1835_v32, %v1681_v37  ;;  %v1831_v9 = vsel %vm1829_vm5, %v2838_v1, %v2843_v24 }
 0x185   : > { %v2845_v15 = vpop.permute.xlu1 %1654  ;;  %v1685_v25 = vpop.permute.xlu0 %1684 }
 0x186   : > { %v1842_v45 = vsel %vm1839_vm7, %v1837_v16, %v1685_v25  ;;  %v1833_v5 = vsel %vm1829_vm5, %v2841_v18, %v2845_v15 }
 0x189   : > { %v2847_v43 = vpop.permute.xlu1 %1666  ;;  %v1697_v27 = vpop.permute.xlu0 %1696 }
 0x18a   : > { %v1845_v30 = vsel %vm1844_vm8, %v1840_v6, %v1697_v27  ;;  %v1836_v39 = vsel %vm1834_vm6, %v1831_v9, %v2847_v43 }
 0x18d   : > { %v2849_v51 = vpop.permute.xlu1 %1670  ;;  %v1701_v56 = vpop.permute.xlu0 %1700 }
 0x18e   : > { %v1847_v12 = vsel %vm1844_vm8, %v1842_v45, %v1701_v56  ;;  %v1838_v46 = vsel %vm1834_vm6, %v1833_v5, %v2849_v51 }
 0x191   : > { %v1683_v38 = vpop.permute.xlu1 %1682  ;;  %v1713_v61 = vpop.permute.xlu0 %1712 }
 0x192   : > { %v1850_v53 = vsel %vm1849_vm9, %v1845_v30, %v1713_v61  ;;  %v1841_v33 = vsel %vm1839_vm7, %v1836_v39, %v1683_v38 }
 0x195   : > { %v2851_v63 = vpop.permute.xlu1 %1686  ;;  %v1717_v60 = vpop.permute.xlu0 %1716 }
 0x196   : > { %v1852_v48 = vsel %vm1849_vm9, %v1847_v12, %v1717_v60  ;;  %v1843_v11 = vsel %vm1839_vm7, %v1838_v46, %v2851_v63 }
 0x199   : > { %v1699_v4 = vpop.permute.xlu1 %1698  ;;  %v1729_v35 = vpop.permute.xlu0 %1728 }
 0x19a   : > { %v1855_v57 = vsel %vm1854_vm10, %v1850_v53, %v1729_v35  ;;  %v1846_v59 = vsel %vm1844_vm8, %v1841_v33, %v1699_v4 }
 0x19d   : > { %v2853_v17 = vpop.permute.xlu1 %1702  ;;  %v1733_v23 = vpop.permute.xlu0 %1732 }
 0x19e   : > { %v1857_v55 = vsel %vm1854_vm10, %v1852_v48, %v1733_v23  ;;  %v1848_v37 = vsel %vm1844_vm8, %v1843_v11, %v2853_v17 }
 0x1a1   : > { %v1715_v31 = vpop.permute.xlu1 %1714  ;;  %v1745_v28 = vpop.permute.xlu0 %1744 }
 0x1a2   : > { %v1860_v2 = vsel %vm1859_vm11, %v1855_v57, %v1745_v28  ;;  %v1851_v62 = vsel %vm1849_vm9, %v1846_v59, %v1715_v31 }
 0x1a5   : > { %v1719_v7 = vpop.permute.xlu1 %1718  ;;  %v1749_v22 = vpop.permute.xlu0 %1748 }
 0x1a6   : > { %v1862_v21 = vsel %vm1859_vm11, %v1857_v55, %v1749_v22  ;;  %v1853_v18 = vsel %vm1849_vm9, %v1848_v37, %v1719_v7 }
 0x1a9   : > { %v1731_v47 = vpop.permute.xlu1 %1730  ;;  %v1761_v14 = vpop.permute.xlu0 %1760 }
 0x1aa   : > { %v1865_v54 = vsel %vm1864_vm12, %v1860_v2, %v1761_v14  ;;  %v1856_v1 = vsel %vm1854_vm10, %v1851_v62, %v1731_v47 }
 0x1ad   : > { %v1735_v26 = vpop.permute.xlu1 %1734  ;;  %v1765_v29 = vpop.permute.xlu0 %1764 }
 0x1ae   : > { %v1867_v3 = vsel %vm1864_vm12, %v1862_v21, %v1765_v29  ;;  %v1858_v27 = vsel %vm1854_vm10, %v1853_v18, %v1735_v26 }
 0x1b1   : > { %v1747_v41 = vpop.permute.xlu1 %1746  ;;  %v1777_v42 = vpop.permute.xlu0 %1776 }
 0x1b2   : > { %v1870_v50 = vsel %vm1869_vm13, %v1865_v54, %v1777_v42  ;;  %v1861_v24 = vsel %vm1859_vm11, %v1856_v1, %v1747_v41 }
 0x1b5   : > { %v1751_v58 = vpop.permute.xlu1 %1750  ;;  %v1781_v40 = vpop.permute.xlu0 %1780 }
 0x1b6   : > { %v1872_v0 = vsel %vm1869_vm13, %v1867_v3, %v1781_v40  ;;  %v1863_v56 = vsel %vm1859_vm11, %v1858_v27, %v1751_v58 }
 0x1b9   : > { %v1763_v49 = vpop.permute.xlu1 %1762  ;;  %v1793_v52 = vpop.permute.xlu0 %1792 }
 0x1ba   : > { %v1875_v20 = vsel %vm1874_vm14, %v1870_v50, %v1793_v52  ;;  %v1866_v25 = vsel %vm1864_vm12, %v1861_v24, %v1763_v49 }
 0x1bb   : > { %1883 = vrot.lane.b32.xlu0 %v1875_v20, %s2023_s28 }
 0x1bd   : > { %v1767_v8 = vpop.permute.xlu1 %1766  ;;  %v1797_v19 = vpop.permute.xlu0 %1796 }
 0x1be   : > { %v1877_v34 = vsel %vm1874_vm14, %v1872_v0, %v1797_v19  ;;  %v1868_v38 = vsel %vm1864_vm12, %v1863_v56, %v1767_v8 }
 0x1bf   : > { %1887 = vrot.lane.b32.xlu0 %v1877_v34, %s2023_s28 }
 0x1c1   : > { %v1779_v36 = vpop.permute.xlu1 %1778 }
 0x1c2   : > { %v1871_v15 = vsel %vm1869_vm13, %v1866_v25, %v1779_v36 }
 0x1c5   : > { %v1783_v10 = vpop.permute.xlu1 %1782 }
 0x1c6   : > { %v1873_v61 = vsel %vm1869_vm13, %v1868_v38, %v1783_v10 }
 0x1c9   : > { %v1795_v43 = vpop.permute.xlu1 %1794 }
 0x1ca   : > { %v1876_v51 = vsel %vm1874_vm14, %v1871_v15, %v1795_v43 }
 0x1cb   : > { %1885 = vrot.lane.b32.xlu1 %v1876_v51, %s2023_s28 }
 0x1cd   : > { %v1799_v63 = vpop.permute.xlu1 %1798 }
 0x1ce   : > { %v1878_v60 = vsel %vm1874_vm14, %v1873_v61, %v1799_v63 }
 0x1cf   : > { %1889 = vrot.lane.b32.xlu1 %v1878_v60, %s2023_s28 }
 0x22d   : > { %v1884_v4 = vpop.permute.xlu0 %1883 }
 0x22e   : > { %v1896_v35 = vsel %vm1895_vm15, %v1875_v20, %v1884_v4 }
 0x22f   : > { %1901 = vst.msk [vmem:[%s118_s2] sm:$0xff] %vm1900_vm0, %v1896_v35 }
 0x231   : > { %v1888_v17 = vpop.permute.xlu0 %1887 }
 0x232   : > { %v1898_v23 = vsel %vm1895_vm15, %v1877_v34, %v1888_v17 }
 0x233   : > { %1903 = vst.msk [vmem:[%s118_s2 + $0x10] sm:$0xff] %vm1900_vm0, %v1898_v23 }
 0x23d   : > { %v1886_v31 = vpop.permute.xlu1 %1885 }
 0x23e   : > { %v1897_v28 = vsel %vm1895_vm15, %v1876_v51, %v1886_v31 }
 0x23f   : > { %1902 = vst.msk [vmem:[%s118_s2 + $0x8] sm:$0xff] %vm1900_vm0, %v1897_v28 }
 0x241   : > { %v1890_v7 = vpop.permute.xlu1 %1889 }
 0x242   : > { %v1899_v22 = vsel %vm1895_vm15, %v1878_v60, %v1890_v7 }
 0x243   : > { %1904 = vst.msk [vmem:[%s118_s2 + $0x18] sm:$0xff] %vm1900_vm0, %v1899_v22 }
 0x244 PF: > { %s11_s6 = sadd.s32 1, %s2004_s6  }
 0x245   : > { %p8_p4 = scmp.ge.s32.totalorder %s11_s6, 6  }
 0x247   :  { %10 = sbr.rel (!%p8_p4) target bundleno = 1 (0x1), region = 54 }

// kernel: tpu_custom_call.1
= control target key start
LH: loop header
LB: loop body
LE: loop exit
PB: predicated region body
PF: predicated region fallthrough
CT: control target
= control target key end

     0   :  { %s997_s9 = smov 0   ;;  %s1039_s0 = inlined_call_operand.vmem [shape: f32[128,16], index: 0, kind: input, shape index: {}]   ;;  %s1040_s1 = inlined_call_operand.vmem [shape: f32[16,64], index: 1, kind: input, shape index: {}]   ;;  %s1041_s2 = inlined_call_operand.vmem [shape: f32[128,64], index: 2, kind: output, shape index: {}]  }
   0x1 LB: > { %s815_s10 = sadd.s32 4294967295, %s980_s9   ;;  %p819_p0 = scmp.ge.s32.totalorder %s980_s9, 1  ;;  %s980_s9 = sphi %s997_s9, %s12_s9  }
   0x2   : > { %p113_p1 = scmp.lt.s32.totalorder %s980_s9, 5 }
   0x4   : > { %p114_p2 = pnand %p819_p0, %p113_p1 }
   0x5   : > { %v151_v0 = vld [vmem:[%s1040_s1] sm:$0xff] (!%p114_p2)  ;;  %v152_v1 = vld [vmem:[%s1040_s1 + $0x8] sm:$0xff] (!%p114_p2)  ;;  %s820_s15 = sshll.u32 (!%p114_p2), %s815_s10, 2  ;;  %vm153_vm0 = vcmask (!%p114_p2), 130048   ;;  %vm754_vm1 = vcmask (!%p114_p2), 523264  }
   0x6   : > { %117 = sbr.rel (%p114_p2) target bundleno = 265 (0x109), region = 28  ;;  %v167_v2 = vand.u32 (!%p114_p2), 4294901760, %v151_v0  ;;  %v170_v3 = vand.u32 (!%p114_p2), 4294901760, %v152_v1  ;;  %p136_p3 = scmp.lt.s32.totalorder (!%p114_p2), %s820_s15, 15 }
   0x8   : > { %v1011_v4 = vpack.c.bf16 (!%p114_p2), %v170_v3, %v167_v2  ;;  %v275_v5 = vsub.f32 (!%p114_p2), %v151_v0, %v167_v2  ;;  %v282_v6 = vsub.f32 (!%p114_p2), %v152_v1, %v170_v3 }
   0xa   : > { %935 = vmatprep.subr.bf16.mxu0 (!%p114_p2), %v1011_v4  ;;  %923 = vmatprep.subr.bf16.mxu1 (!%p114_p2), %v1011_v4  ;;  %v276_v7 = vand.u32 (!%p114_p2), 4294901760, %v275_v5  ;;  %v283_v8 = vand.u32 (!%p114_p2), 4294901760, %v282_v6  ;;  %v930_v42 = vpack.c.bf16 (!%p114_p2), %v282_v6, %v275_v5 }
   0xb   : > { %937 = vmatpush3.bf16.msra.mxu0 (!%p114_p2), %v1011_v4  ;;  %925 = vmatpush3.bf16.msra.mxu1 (!%p114_p2), %v1011_v4 }
   0xc   : > { %v277_v11 = vsub.f32 (!%p114_p2), %v275_v5, %v276_v7  ;;  %v284_v12 = vsub.f32 (!%p114_p2), %v282_v6, %v283_v8  ;;  %v938_v14 = vpack.c.bf16 (!%p114_p2), %v283_v8, %v276_v7 }
   0xd   : > { %s1043_s15 = smov (!%p136_p3, %s820_s15), 15 }
   0xe   : > { %s821_s16 = sshll.u32 %s1043_s15, 3  ;;  %v278_v21 = vand.u32 4294901760, %v277_v11  ;;  %v285_v22 = vand.u32 4294901760, %v284_v12  ;;  %939 = vmatprep.subr.bf16.mxu0 %v938_v14 }
   0xf   : > { %s139_s19 = scalar_lea.vmem %s1039_s0, %s821_s16  ;;  %s145_s22 = scalar_lea.vmem %s1041_s2, %s821_s16 }
  0x10   : > { %v147_v9 = vld [vmem:[%s139_s19] sm:$0xff]  ;;  %v148_v10 = vld [vmem:[%s139_s19 + $0x8] sm:$0xff]  ;;  %v149_v13 = vld [vmem:[%s139_s19 + $0x10] sm:$0xff]  ;;  %v926_v27 = vpack.c.bf16 %v285_v22, %v278_v21 }
  0x11   : > { %v155_v15 = vsel %vm153_vm0, %v147_v9, 0  ;;  %v158_v16 = vsel %vm153_vm0, %v148_v10, 0  ;;  %v161_v17 = vsel %vm153_vm0, %v149_v13, 0  ;;  %v150_v18 = vld [vmem:[%s139_s19 + $0x18] sm:$0xff] }
  0x12   : > { %v233_v19 = vand.u32 4294901760, %v155_v15  ;;  %v243_v20 = vand.u32 4294901760, %v158_v16  ;;  %v253_v23 = vand.u32 4294901760, %v161_v17  ;;  %v164_v24 = vsel %vm153_vm0, %v150_v18, 0  ;;  %927 = vmatprep.subr.bf16.mxu1 %v926_v27 }
  0x13   : > { %v263_v28 = vand.u32 4294901760, %v164_v24 }
  0x14   : > { %v234_v25 = vsub.f32 %v155_v15, %v233_v19  ;;  %v244_v26 = vsub.f32 %v158_v16, %v243_v20  ;;  %v254_v29 = vsub.f32 %v161_v17, %v253_v23 }
  0x15   : > { %v264_v32 = vsub.f32 %v164_v24, %v263_v28 }
  0x16   : > { %v235_v30 = vand.u32 4294901760, %v234_v25  ;;  %v245_v31 = vand.u32 4294901760, %v244_v26  ;;  %v255_v33 = vand.u32 4294901760, %v254_v29 }
  0x17   : > { %v265_v36 = vand.u32 4294901760, %v264_v32 }
  0x18   : > { %896 = vmatprep.mubr.f32.mxu0 %v235_v30  ;;  %v236_v34 = vsub.f32 %v234_v25, %v235_v30  ;;  %v246_v35 = vsub.f32 %v244_v26, %v245_v31  ;;  %v256_v37 = vsub.f32 %v254_v29, %v255_v33 }
  0x19   : > { %897 = vmatmul.mubr.f32.vlgmr.msra.gmra.mrb[0].mxu0 %v245_v31  ;;  %v266_v40 = vsub.f32 %v264_v32, %v265_v36 }
  0x1a   : > { %v237_v38 = vand.u32 4294901760, %v236_v34  ;;  %899 = vmatprep.mubr.f32.mxu0 %v255_v33  ;;  %v247_v39 = vand.u32 4294901760, %v246_v35  ;;  %941 = vmatpush3.bf16.msra.mxu0 %v938_v14  ;;  %v257_v41 = vand.u32 4294901760, %v256_v37 }
  0x1b   : > { %943 = vmatprep.subr.bf16.mxu0 %v1011_v4  ;;  %v267_v43 = vand.u32 4294901760, %v266_v40 }
  0x1c   : > { %866 = vmatprep.mubr.f32.mxu1 %v237_v38 }
  0x1d   : > { %867 = vmatmul.mubr.f32.vlgmr.msra.gmra.mrb[0].mxu1 %v247_v39  ;;  %900 = vmatmul.mubr.f32.gmra.mrb[2].mxu0 %v265_v36 }
  0x1e   : > { %929 = vmatpush3.bf16.msra.mxu1 %v926_v27  ;;  %869 = vmatprep.mubr.f32.mxu1 %v257_v41 }
  0x1f   : > { %906 = vmatprep.mubr.f32.mxu0 %v233_v19  ;;  %931 = vmatprep.subr.bf16.mxu1 %v930_v42 }
  0x21   : > { %870 = vmatmul.mubr.f32.gmra.mrb[2].mxu1 %v267_v43  ;;  %907 = vmatmul.mubr.f32.vlgmr.msra.gmra.mrb[0].mxu0 %v243_v20 }
  0x22   : > { %876 = vmatprep.mubr.f32.mxu1 %v233_v19  ;;  %909 = vmatprep.mubr.f32.mxu0 %v253_v23 }
  0x23   : > { %945 = vmatpush3.bf16.msra.mxu0 %v1011_v4 }
  0x25   : > { %877 = vmatmul.mubr.f32.vlgmr.msra.gmra.mrb[0].mxu1 %v243_v20  ;;  %910 = vmatmul.mubr.f32.gmra.mrb[2].mxu0 %v263_v28 }
  0x26   : > { %933 = vmatpush3.bf16.msra.mxu1 %v930_v42  ;;  %879 = vmatprep.mubr.f32.mxu1 %v253_v23 }
  0x27   : > { %916 = vmatprep.mubr.f32.mxu0 %v233_v19 }
  0x29   : > { %880 = vmatmul.mubr.f32.gmra.mrb[2].mxu1 %v263_v28  ;;  %917 = vmatmul.mubr.f32.vlgmr.msra.gmra.mrb[0].mxu0 %v243_v20 }
  0x2a   : > { %886 = vmatprep.mubr.f32.mxu1 %v234_v25  ;;  %919 = vmatprep.mubr.f32.mxu0 %v253_v23 }
  0x2d   : > { %887 = vmatmul.mubr.f32.vlgmr.msra.gmra.mrb[0].mxu1 %v244_v26  ;;  %920 = vmatmul.mubr.f32.gmra.mrb[2].mxu0 %v263_v28 }
  0x2e   : > { %889 = vmatprep.mubr.f32.mxu1 %v254_v29 }
  0x31   : > { %890 = vmatmul.mubr.f32.gmra.mrb[2].mxu1 %v264_v32 }
  0xfc   : > { %v918_v44 = vpop.f32.mrb[0].mxu0 }
  0xfd   : > { %v732_v45 = vpop.f32.mrb[1].mxu0 }
 0x100   : > { %v888_v46 = vpop.f32.mrb[0].mxu1  ;;  %v921_v47 = vpop.f32.mrb[2].mxu0 }
 0x101   : > { %v946_v48 = vadd.f32 %v918_v44, %v888_v46  ;;  %v444_v49 = vpop.f32.mrb[1].mxu1  ;;  %v744_v50 = vpop.f32.mrb[3].mxu0 }
 0x102   : > { %v947_v51 = vadd.f32 %v732_v45, %v444_v49 }
 0x103   : > { %756 = vst.msk [vmem:[%s145_s22 + $0x8] sm:$0xff] %vm754_vm1, %v946_v48 }
 0x104   : > { %755 = vst.msk [vmem:[%s145_s22] sm:$0xff] %vm754_vm1, %v947_v51  ;;  %v891_v52 = vpop.f32.mrb[2].mxu1 }
 0x105   : > { %v948_v53 = vadd.f32 %v921_v47, %v891_v52  ;;  %v458_v54 = vpop.f32.mrb[3].mxu1 }
 0x106   : > { %v949_v55 = vadd.f32 %v744_v50, %v458_v54 }
 0x107   : > { %758 = vst.msk [vmem:[%s145_s22 + $0x18] sm:$0xff] %vm754_vm1, %v948_v53 }
 0x108   : > { %757 = vst.msk [vmem:[%s145_s22 + $0x10] sm:$0xff] %vm754_vm1, %v949_v55 }
 0x109 PF: > { %s12_s9 = sadd.s32 1, %s980_s9  }
 0x10a   : > { %p9_p4 = scmp.ge.s32.totalorder %s12_s9, 6  }
 0x10c   :  { %11 = sbr.rel (!%p9_p4) target bundleno = 1 (0x1), region = 58 }

</bundles_post_ra>
